<compile_context>
chip_gen: v7x
topology: tpu7x:2x2x1
jax: 0.10.0
libtpu: 0.0.40
codegen_flags: <defaults>
</compile_context>

<pallas_src>
import math

import numpy as np
import jax
import jax.numpy as jnp
from jax.experimental import pallas as pl
from jax.experimental.pallas import tpu as pltpu

# ------------------------- config (small, consistent with the module) -------------------------
B = 2            # batch
N_VARS = 1       # enc_in  (Conv_out / ST_layer experts are built with fea_dim=1 -> must be 1)
SEQ_LEN = 16
LABEL_LEN = 8
PRED_LEN = 8
D_MODEL = 32
N_HEADS = 3
D_KEYS = D_MODEL            # VisOutputAttentionLayer is built with d_keys=configs.d_model
LAYER_NUM = 2
DECOMP_K = 25
NUM_EXPERTS = 4
EPS = 1e-5

# ------------------------------ weight-slab layout (static) -----------------------------------
# lanes: [ general_l1 | moe_mlp_l1 | st_res_l1 | st_mean_l1 | conv_expert | vis_expert ]
_LW = 6 * D_MODEL            # 192 lanes
_R_W1 = 0                    # W_first   (SEQ_LEN, 192)
_R_B1 = 16                   # b_first   (1, 192)          rows 17..23 zero-pad
_R_W2 = 24                   # W_second  (128, 128)        block-diag [gW2, mW2, sW2, sW2]
_R_B2 = 152                  # b_second  (1, 128)          rows 153..159 zero-pad
_R_OW = 160                  # oW        (32, PRED_LEN)
_R_OB = 192                  # ob        (1, PRED_LEN)     rows 193..199 zero-pad
_SLAB_ROWS = 200


# ======================================= fused kernel =========================================


def _fused_forward_kernel(x_ref, w_ref, slab_ref, out_ref):
    f32 = jnp.float32
    D = D_MODEL

    # ---- Normalize (RevIN-style, affine=False): stats over time, sqrt(var + eps) ----
    x = x_ref[...]                                            # (B, SEQ_LEN)
    mu = jnp.mean(x, axis=-1, keepdims=True)
    var = jnp.mean((x - mu) ** 2, axis=-1, keepdims=True)     # unbiased=False
    std = jnp.sqrt(var + EPS)
    xn = (x - mu) / std

    # ---- stage 1: one lane-dense dot covers every weight consuming the input sequence ----
    w1 = slab_ref[_R_W1:_R_W1 + SEQ_LEN, :]                   # (16, 192)
    b1 = slab_ref[_R_B1:_R_B1 + 1, :]                         # (1, 192)
    h1 = jnp.dot(xn, w1, preferred_element_type=f32) + b1     # (B, 192)

    # ---- stage 2: block-diag second linear for [general | moe_mlp | st_res | st_mean] ----
    hs = jax.nn.sigmoid(h1[:, 0:4 * D])                       # (B, 128)
    w2 = slab_ref[_R_W2:_R_W2 + 4 * D, 0:4 * D]               # (128, 128)
    b2 = slab_ref[_R_B2:_R_B2 + 1, 0:4 * D]                   # (1, 128)
    h2 = jax.nn.sigmoid(jnp.dot(hs, w2, preferred_element_type=f32) + b2)

    g = h2[:, 0:D]                                            # general_mlp output
    e_mlp = h2[:, D:2 * D]                                    # expert 0: MLP_layer
    e_st = h2[:, 2 * D:3 * D] + h2[:, 3 * D:4 * D]            # expert 1: ST_layer (res + trend)
    e_conv = h1[:, 4 * D:5 * D]                               # expert 2: Conv_out (folded, linear)
    e_vis = h1[:, 5 * D:6 * D]                                # expert 3: vis attention (folded, linear)

    # ---- MoE combine: einsum('bpne,be->bpn') with n == 1 ----
    w = w_ref[...]                                            # (B, NUM_EXPERTS)
    moe = (e_mlp * w[:, 0:1] + e_st * w[:, 1:2]
           + e_conv * w[:, 2:3] + e_vis * w[:, 3:4])

    # ---- output_linear + de-normalize ----
    ow = slab_ref[_R_OW:_R_OW + D, 0:PRED_LEN]                # (32, 8)
    ob = slab_ref[_R_OB:_R_OB + 1, 0:PRED_LEN]                # (1, 8)
    o = jnp.dot(moe + g, ow, preferred_element_type=f32) + ob
    out_ref[...] = o * std + mu


def _zero2(i):
    return (0, 0)


def fused_forward(x2, weight, slab):
    # One pallas_call for the whole forward; every operand is a full-array VMEM block.
    return pl.pallas_call(
        _fused_forward_kernel,
        out_shape=jax.ShapeDtypeStruct((x2.shape[0], PRED_LEN), jnp.float32),
        grid=(1,),
        in_specs=[pl.BlockSpec(x2.shape, _zero2),
                  pl.BlockSpec(weight.shape, _zero2),
                  pl.BlockSpec(slab.shape, _zero2)],
        out_specs=pl.BlockSpec((x2.shape[0], PRED_LEN), _zero2),
        compiler_params=pltpu.CompilerParams(dimension_semantics=("arbitrary",)),
    )(x2, weight, slab)


# ==================================== parameter packing =======================================


def _decomp_matrix(seq_len, ksize):
    # moving_mean = x @ M, where M encodes replicate padding + AvgPool1d(ksize, stride=1).
    pad = (ksize - 1) // 2
    m = np.zeros((seq_len, seq_len), dtype=np.float32)
    for l in range(seq_len):
        for j in range(ksize):
            i = l + j
            if i < pad:
                s = 0
            elif i < pad + seq_len:
                s = i - pad
            else:
                s = seq_len - 1
            m[s, l] += 1.0 / ksize
    return m


def pack_params(params):
    """One-time parameter prep: all algebraic folds + one pre-padded lane-dense slab."""
    def wb(p):
        return np.asarray(p["w"], np.float32), np.asarray(p["b"], np.float32).reshape(1, -1)

    D = D_MODEL
    gW1, gb1 = wb(params["general_mlp"]["l1"])
    gW2, gb2 = wb(params["general_mlp"]["l2"])
    mW1, mb1 = wb(params["moe_mlp"]["l1"])
    mW2, mb2 = wb(params["moe_mlp"]["l2"])
    sW1, sb1 = wb(params["moe_st"]["mlp"]["l1"])
    sW2, sb2 = wb(params["moe_st"]["mlp"]["l2"])

    # Fold Conv1d(1,1,3,pad=1) into the preceding Linear:  conv(h) = h @ K + conv_b.
    # (PyTorch cross-correlation: out[i] = w0*in[i-1] + w1*in[i] + w2*in[i+1], zero pad.)
    cwk = np.asarray(params["moe_conv"]["conv_w"], np.float32)
    cbk = np.asarray(params["moe_conv"]["conv_b"], np.float32)
    K = (cwk[1] * np.eye(D, dtype=np.float32)
         + cwk[0] * np.eye(D, k=1, dtype=np.float32)
         + cwk[2] * np.eye(D, k=-1, dtype=np.float32))
    cW, cb = wb(params["moe_conv"]["lin"])
    cW_eff = cW @ K
    cb_eff = cb @ K + cbk.reshape(1, 1)

    # Fold expert 3 (vis attention) into a single affine map.  Sequence length is 1, so
    # softmax == 1 and each attention layer is exactly out_proj(value_proj(.)); all linear.
    vis = params["moe_vis"]
    vV0, vVb0 = wb(vis["attn"][0]["v"]); vO0, vOb0 = wb(vis["attn"][0]["o"])
    vV1, vVb1 = wb(vis["attn"][1]["v"]); vO1, vOb1 = wb(vis["attn"][1]["o"])
    A1, c1 = vV0 @ vO0, vVb0 @ vO0 + vOb0
    A2, c2 = vV1 @ vO1, vVb1 @ vO1 + vOb1
    # rearrange '(b v) f p -> b v (p f)' flattens with index p*(LAYER_NUM+1)+f (f innermost);
    # split out_linear rows per f accordingly.
    visW, visb = wb(vis["out"])
    visW_f = [visW[f::LAYER_NUM + 1, :] for f in range(LAYER_NUM + 1)]
    W_vis = visW_f[0] + A1 @ visW_f[1] + A1 @ A2 @ visW_f[2]
    b_vis = c1 @ visW_f[1] + (c1 @ A2 + c2) @ visW_f[2] + visb

    # Fold series_decomp (replicate-pad + AvgPool1d(25)) into the ST expert's first linear.
    M = _decomp_matrix(LABEL_LEN, DECOMP_K)
    sW1_mean = M @ sW1
    sW1_res = sW1 - sW1_mean                      # == (I - M) @ sW1

    # First-stage concat: weights consuming x_lab get zero rows for the first SEQ-LABEL steps,
    # so a single dot from the full normalized sequence serves every branch.
    def lab_pad(w):
        return np.concatenate(
            [np.zeros((SEQ_LEN - LABEL_LEN, w.shape[1]), np.float32), w], axis=0)

    W_first = np.concatenate(
        [gW1, lab_pad(mW1), lab_pad(sW1_res), lab_pad(sW1_mean),
         lab_pad(cW_eff), lab_pad(W_vis)], axis=1)                       # (16, 192)
    b_first = np.concatenate([gb1, mb1, sb1, sb1, cb_eff, b_vis], axis=1)  # (1, 192)

    # Second-stage block-diagonal: [general_l2, moe_mlp_l2, st_l2, st_l2] (ST MLP is shared).
    W_second = np.zeros((4 * D, 4 * D), np.float32)
    for i, w2 in enumerate([gW2, mW2, sW2, sW2]):
        W_second[i * D:(i + 1) * D, i * D:(i + 1) * D] = w2
    b_second = np.concatenate([gb2, mb2, sb2, sb2], axis=1)              # (1, 128)

    oW, ob = wb(params["output_linear"])                                 # (32, 8), (1, 8)

    # Pack everything into one lane-dense slab (row sections 8-aligned).
    slab = np.zeros((_SLAB_ROWS, _LW), np.float32)
    slab[_R_W1:_R_W1 + SEQ_LEN, :] = W_first
    slab[_R_B1:_R_B1 + 1, :] = b_first
    slab[_R_W2:_R_W2 + 4 * D, 0:4 * D] = W_second
    slab[_R_B2:_R_B2 + 1, 0:4 * D] = b_second
    slab[_R_OW:_R_OW + D, 0:PRED_LEN] = oW
    slab[_R_OB:_R_OB + 1, 0:PRED_LEN] = ob
    return jnp.asarray(slab)


# ========================================== forward ===========================================


def model_forward(slab, x_enc, x_mark_enc, x_dec=None, x_mark_dec=None):
    # x_dec / x_mark_dec are unused by Model.forecast (matches the PyTorch code).
    Bb, S, N = x_enc.shape
    assert N == 1, "Conv_out expert is built with fea_dim=1"
    x2 = x_enc.reshape(Bb, S)                 # N == 1 -> pure reshape, no data movement
    weight = x_mark_enc[:, :, 0]              # (B, num_experts)
    dec2 = fused_forward(x2, weight, slab)    # (B, pred_len)
    dec = dec2.reshape(Bb, PRED_LEN, N)
    t = ([], weight, [])
    return dec[:, -PRED_LEN:, :], t


# =========================================== params ===========================================


def init_linear(key, in_dim, out_dim):
    kw, kb = jax.random.split(key)
    bound = 1.0 / math.sqrt(in_dim)
    return {"w": jax.random.uniform(kw, (in_dim, out_dim), jnp.float32, -bound, bound),
            "b": jax.random.uniform(kb, (out_dim,), jnp.float32, -bound, bound)}


def init_params(key):
    keys = jax.random.split(key, 32)
    it = iter(keys)
    attn_layers = []
    for _ in range(LAYER_NUM):
        attn_layers.append({
            # q / k are mathematically dead (attention over a length-1 sequence); kept for
            # structural fidelity with the module but never packed into the kernel.
            "q": init_linear(next(it), LABEL_LEN, D_KEYS * N_HEADS),
            "k": init_linear(next(it), LABEL_LEN, D_KEYS * N_HEADS),
            "v": init_linear(next(it), LABEL_LEN, D_KEYS * N_HEADS),
            "o": init_linear(next(it), D_KEYS * N_HEADS, LABEL_LEN),
        })
    return {
        "general_mlp": {"l1": init_linear(next(it), SEQ_LEN, D_MODEL),
                        "l2": init_linear(next(it), D_MODEL, D_MODEL)},
        "moe_mlp": {"l1": init_linear(next(it), LABEL_LEN, D_MODEL),
                    "l2": init_linear(next(it), D_MODEL, D_MODEL)},
        "moe_st": {"mlp": {"l1": init_linear(next(it), LABEL_LEN, D_MODEL),
                           "l2": init_linear(next(it), D_MODEL, D_MODEL)}},
        "moe_conv": {"lin": init_linear(next(it), LABEL_LEN, D_MODEL),
                     "conv_w": 0.3 * jax.random.normal(next(it), (3,), jnp.float32),
                     "conv_b": 0.1 * jax.random.normal(next(it), (1,), jnp.float32)},
        "moe_vis": {"attn": attn_layers,
                    "out": init_linear(next(it), LABEL_LEN * (LAYER_NUM + 1), D_MODEL)},
        "output_linear": init_linear(next(it), D_MODEL, PRED_LEN),
    }


# TODO(synk): do_patch=True branch (PatchEmbedding / FlattenHead decoder) is never executed
#             in this configuration and is not implemented.

if __name__ == "__main__":
    key = jax.random.PRNGKey(0)
    kp, kx, km, kd, kmd = jax.random.split(key, 5)
    params = init_params(kp)
    slab = pack_params(params)                            # parameter prep: done once

    x_enc = jax.random.normal(kx, (B, SEQ_LEN, N_VARS), jnp.float32)
    # x_mark_enc[:, :, 0] is used as the (B, num_experts) MoE mixing weight.
    x_mark_enc = jax.random.uniform(km, (B, NUM_EXPERTS, 3), jnp.float32)
    x_dec = jax.random.normal(kd, (B, LABEL_LEN + PRED_LEN, N_VARS), jnp.float32)      # unused
    x_mark_dec = jax.random.uniform(kmd, (B, LABEL_LEN + PRED_LEN, 3), jnp.float32)    # unused

    fwd = jax.jit(model_forward)
    dec_out, t = fwd(slab, x_enc, x_mark_enc, x_dec, x_mark_dec)
    dec_out = jax.block_until_ready(dec_out)
    assert dec_out.shape == (B, PRED_LEN, N_VARS), dec_out.shape
    assert jnp.all(jnp.isfinite(dec_out))
    print("KERNEL_OK")
</pallas_src>

<mosaic_0001>
module attributes {stable_mosaic.version = 11 : i64} {
  func.func @_fused_forward_kernel(%arg0: i32, %arg1: memref<2x16xf32, #tpu.memory_space<vmem>>, %arg2: memref<2x4xf32, #tpu.memory_space<vmem>>, %arg3: memref<200x192xf32, #tpu.memory_space<vmem>>, %arg4: memref<2x8xf32, #tpu.memory_space<vmem>>) attributes {dimension_semantics = [#tpu.dimension_semantics<arbitrary>], iteration_bounds = array<i64: 1>, scalar_prefetch = 0 : i64, scratch_operands = 0 : i64, tpu.core_type = #tpu.core_type<tc>, window_params = [{pipeline_mode = #tpu.pipeline_mode<synchronous>, transform_indices = @transform_0, window_bounds = array<i64: 2, 16>}, {pipeline_mode = #tpu.pipeline_mode<synchronous>, transform_indices = @transform_1, window_bounds = array<i64: 2, 4>}, {pipeline_mode = #tpu.pipeline_mode<synchronous>, transform_indices = @transform_2, window_bounds = array<i64: 200, 192>}, {pipeline_mode = #tpu.pipeline_mode<synchronous>, transform_indices = @transform_3, window_bounds = array<i64: 2, 8>}]} {
    %c0 = arith.constant 0 : index
    %c0_0 = arith.constant 0 : index
    %0 = vector.load %arg1[%c0, %c0_0] : memref<2x16xf32, #tpu.memory_space<vmem>>, vector<2x16xf32>
    %cst = arith.constant dense<0.000000e+00> : vector<2xf32>
    %1 = vector.multi_reduction <add>, %0, %cst [1] : vector<2x16xf32> to vector<2xf32>
    %2 = vector.shape_cast %1 : vector<2xf32> to vector<2x1xf32>
    %cst_1 = arith.constant 1.600000e+01 : f32
    %3 = vector.broadcast %cst_1 : f32 to vector<2x1xf32>
    %4 = arith.divf %2, %3 : vector<2x1xf32>
    %5 = vector.broadcast %4 : vector<2x1xf32> to vector<2x16xf32>
    %6 = arith.subf %0, %5 : vector<2x16xf32>
    %7 = arith.mulf %6, %6 : vector<2x16xf32>
    %cst_2 = arith.constant dense<0.000000e+00> : vector<2xf32>
    %8 = vector.multi_reduction <add>, %7, %cst_2 [1] : vector<2x16xf32> to vector<2xf32>
    %9 = vector.shape_cast %8 : vector<2xf32> to vector<2x1xf32>
    %cst_3 = arith.constant 1.600000e+01 : f32
    %10 = vector.broadcast %cst_3 : f32 to vector<2x1xf32>
    %11 = arith.divf %9, %10 : vector<2x1xf32>
    %cst_4 = arith.constant 9.99999974E-6 : f32
    %12 = vector.broadcast %cst_4 : f32 to vector<2x1xf32>
    %13 = arith.addf %11, %12 : vector<2x1xf32>
    %14 = math.sqrt %13 : vector<2x1xf32>
    %15 = vector.broadcast %4 : vector<2x1xf32> to vector<2x16xf32>
    %16 = arith.subf %0, %15 : vector<2x16xf32>
    %17 = vector.broadcast %14 : vector<2x1xf32> to vector<2x16xf32>
    %18 = arith.divf %16, %17 : vector<2x16xf32>
    %c0_5 = arith.constant 0 : index
    %c0_6 = arith.constant 0 : index
    %19 = vector.load %arg3[%c0_5, %c0_6] : memref<200x192xf32, #tpu.memory_space<vmem>>, vector<16x192xf32>
    %c16 = arith.constant 16 : index
    %c0_7 = arith.constant 0 : index
    %20 = vector.load %arg3[%c16, %c0_7] : memref<200x192xf32, #tpu.memory_space<vmem>>, vector<1x192xf32>
    %cst_8 = arith.constant dense<0.000000e+00> : vector<2x192xf32>
    %21 = tpu.matmul %18, %19, %cst_8 {dimension_numbers = #tpu.dot_dimension_numbers<[1], [0], [0], [1], [0, 0, 1, 1], [], []>} : vector<2x16xf32>, vector<16x192xf32>, vector<2x192xf32> -> vector<2x192xf32>
    %22 = vector.broadcast %20 : vector<1x192xf32> to vector<2x192xf32>
    %23 = arith.addf %21, %22 : vector<2x192xf32>
    %24 = vector.extract_strided_slice %23 {offsets = [0, 0], sizes = [2, 128], strides = [1, 1]} : vector<2x192xf32> to vector<2x128xf32>
    %25 = arith.negf %24 : vector<2x128xf32>
    %26 = math.exp %25 : vector<2x128xf32>
    %cst_9 = arith.constant 1.000000e+00 : f32
    %27 = vector.broadcast %cst_9 : f32 to vector<2x128xf32>
    %28 = arith.addf %27, %26 : vector<2x128xf32>
    %29 = arith.divf %27, %28 : vector<2x128xf32>
    %c24 = arith.constant 24 : index
    %c0_10 = arith.constant 0 : index
    %30 = vector.load %arg3[%c24, %c0_10] : memref<200x192xf32, #tpu.memory_space<vmem>>, vector<128x128xf32>
    %c152 = arith.constant 152 : index
    %c0_11 = arith.constant 0 : index
    %31 = vector.load %arg3[%c152, %c0_11] : memref<200x192xf32, #tpu.memory_space<vmem>>, vector<1x128xf32>
    %cst_12 = arith.constant dense<0.000000e+00> : vector<2x128xf32>
    %32 = tpu.matmul %29, %30, %cst_12 {dimension_numbers = #tpu.dot_dimension_numbers<[1], [0], [0], [1], [0, 0, 1, 1], [], []>} : vector<2x128xf32>, vector<128x128xf32>, vector<2x128xf32> -> vector<2x128xf32>
    %33 = vector.broadcast %31 : vector<1x128xf32> to vector<2x128xf32>
    %34 = arith.addf %32, %33 : vector<2x128xf32>
    %35 = arith.negf %34 : vector<2x128xf32>
    %36 = math.exp %35 : vector<2x128xf32>
    %cst_13 = arith.constant 1.000000e+00 : f32
    %37 = vector.broadcast %cst_13 : f32 to vector<2x128xf32>
    %38 = arith.addf %37, %36 : vector<2x128xf32>
    %39 = arith.divf %37, %38 : vector<2x128xf32>
    %40 = vector.extract_strided_slice %39 {offsets = [0, 0], sizes = [2, 32], strides = [1, 1]} : vector<2x128xf32> to vector<2x32xf32>
    %41 = vector.extract_strided_slice %39 {offsets = [0, 32], sizes = [2, 32], strides = [1, 1]} : vector<2x128xf32> to vector<2x32xf32>
    %42 = vector.extract_strided_slice %39 {offsets = [0, 64], sizes = [2, 32], strides = [1, 1]} : vector<2x128xf32> to vector<2x32xf32>
    %43 = vector.extract_strided_slice %39 {offsets = [0, 96], sizes = [2, 32], strides = [1, 1]} : vector<2x128xf32> to vector<2x32xf32>
    %44 = arith.addf %42, %43 : vector<2x32xf32>
    %45 = vector.extract_strided_slice %23 {offsets = [0, 128], sizes = [2, 32], strides = [1, 1]} : vector<2x192xf32> to vector<2x32xf32>
    %46 = vector.extract_strided_slice %23 {offsets = [0, 160], sizes = [2, 32], strides = [1, 1]} : vector<2x192xf32> to vector<2x32xf32>
    %c0_14 = arith.constant 0 : index
    %c0_15 = arith.constant 0 : index
    %47 = vector.load %arg2[%c0_14, %c0_15] : memref<2x4xf32, #tpu.memory_space<vmem>>, vector<2x4xf32>
    %48 = vector.extract_strided_slice %47 {offsets = [0, 0], sizes = [2, 1], strides = [1, 1]} : vector<2x4xf32> to vector<2x1xf32>
    %49 = vector.broadcast %48 : vector<2x1xf32> to vector<2x32xf32>
    %50 = arith.mulf %41, %49 : vector<2x32xf32>
    %51 = vector.extract_strided_slice %47 {offsets = [0, 1], sizes = [2, 1], strides = [1, 1]} : vector<2x4xf32> to vector<2x1xf32>
    %52 = vector.broadcast %51 : vector<2x1xf32> to vector<2x32xf32>
    %53 = arith.mulf %44, %52 : vector<2x32xf32>
    %54 = arith.addf %50, %53 : vector<2x32xf32>
    %55 = vector.extract_strided_slice %47 {offsets = [0, 2], sizes = [2, 1], strides = [1, 1]} : vector<2x4xf32> to vector<2x1xf32>
    %56 = vector.broadcast %55 : vector<2x1xf32> to vector<2x32xf32>
    %57 = arith.mulf %45, %56 : vector<2x32xf32>
    %58 = arith.addf %54, %57 : vector<2x32xf32>
    %59 = vector.extract_strided_slice %47 {offsets = [0, 3], sizes = [2, 1], strides = [1, 1]} : vector<2x4xf32> to vector<2x1xf32>
    %60 = vector.broadcast %59 : vector<2x1xf32> to vector<2x32xf32>
    %61 = arith.mulf %46, %60 : vector<2x32xf32>
    %62 = arith.addf %58, %61 : vector<2x32xf32>
    %c160 = arith.constant 160 : index
    %c0_16 = arith.constant 0 : index
    %63 = vector.load %arg3[%c160, %c0_16] : memref<200x192xf32, #tpu.memory_space<vmem>>, vector<32x8xf32>
    %c192 = arith.constant 192 : index
    %c0_17 = arith.constant 0 : index
    %64 = vector.load %arg3[%c192, %c0_17] : memref<200x192xf32, #tpu.memory_space<vmem>>, vector<1x8xf32>
    %65 = arith.addf %62, %40 : vector<2x32xf32>
    %cst_18 = arith.constant dense<0.000000e+00> : vector<2x8xf32>
    %66 = tpu.matmul %65, %63, %cst_18 {dimension_numbers = #tpu.dot_dimension_numbers<[1], [0], [0], [1], [0, 0, 1, 1], [], []>} : vector<2x32xf32>, vector<32x8xf32>, vector<2x8xf32> -> vector<2x8xf32>
    %67 = vector.broadcast %64 : vector<1x8xf32> to vector<2x8xf32>
    %68 = arith.addf %66, %67 : vector<2x8xf32>
    %69 = vector.broadcast %14 : vector<2x1xf32> to vector<2x8xf32>
    %70 = arith.mulf %68, %69 : vector<2x8xf32>
    %71 = vector.broadcast %4 : vector<2x1xf32> to vector<2x8xf32>
    %72 = arith.addf %70, %71 : vector<2x8xf32>
    %c0_19 = arith.constant 0 : index
    %c0_20 = arith.constant 0 : index
    %73 = vector.load %arg4[%c0_19, %c0_20] : memref<2x8xf32, #tpu.memory_space<vmem>>, vector<2x8xf32>
    tpu.vector_store %arg4[%c0_19, %c0_20], %72 {strides = array<i32>} : memref<2x8xf32, #tpu.memory_space<vmem>>, vector<2x8xf32>,
    return
  }
  func.func @transform_0(%arg0: i32) -> (i32, i32) {
    %c0_i32 = arith.constant 0 : i32
    %c0_i32_0 = arith.constant 0 : i32
    %c0_i32_1 = arith.constant 0 : i32
    return %c0_i32, %c0_i32_0 : i32, i32
  }
  func.func @transform_1(%arg0: i32) -> (i32, i32) {
    %c0_i32 = arith.constant 0 : i32
    %c0_i32_0 = arith.constant 0 : i32
    %c0_i32_1 = arith.constant 0 : i32
    return %c0_i32, %c0_i32_0 : i32, i32
  }
  func.func @transform_2(%arg0: i32) -> (i32, i32) {
    %c0_i32 = arith.constant 0 : i32
    %c0_i32_0 = arith.constant 0 : i32
    %c0_i32_1 = arith.constant 0 : i32
    return %c0_i32, %c0_i32_0 : i32, i32
  }
  func.func @transform_3(%arg0: i32) -> (i32, i32) {
    %c0_i32 = arith.constant 0 : i32
    %c0_i32_0 = arith.constant 0 : i32
    %c0_i32_1 = arith.constant 0 : i32
    return %c0_i32, %c0_i32_0 : i32, i32
  }
}

</mosaic_0001>

<bundles_post_ra>
// kernel: model_forward.1
= control target key start
LH: loop header
LB: loop body
LE: loop exit
PB: predicated region body
PF: predicated region fallthrough
CT: control target
= control target key end

     0   :  { %vm16_vm0 = vcmask 123904   ;;  %s681_s0 = inlined_call_operand.vmem [shape: f32[2,16], index: 0, kind: input, shape index: {}]   ;;  %s682_s1 = inlined_call_operand.vmem [shape: f32[2,4], index: 1, kind: input, shape index: {}]   ;;  %s683_s2 = inlined_call_operand.vmem [shape: f32[200,192], index: 2, kind: input, shape index: {}]   ;;  %s684_s3 = inlined_call_operand.hbm [shape: f32[2,8], index: 3, kind: output, shape index: {}]  }
   0x1   :  { %v15_v0 = vld [vmem:[%s681_s0] sm:$0x3] }
   0x2   :  { %8 = vsyncpa [#allocation3], 0  ;;  %v17_v1 = vsel %vm16_vm0, %v15_v0, 0.0  ;;  %v39_v7 = vld [vmem:[%s683_s2 + $0x8] sm:$0xff]  ;;  %v41_v8 = vld [vmem:[%s683_s2 + $0x18] sm:$0xff]  ;;  %v528_v12 = vmov 0.0   ;;  %v45_v54 = vlaneseq }
   0x3   :  { %18 = vadd.xlane.f32.xlu0 %v17_v1  ;;  %v38_v9 = vld [vmem:[%s683_s2] sm:$0xff]  ;;  %v443_v10 = vpack.c.bf16 %v41_v8, %v39_v7  ;;  %v40_v11 = vld [vmem:[%s683_s2 + $0x10] sm:$0xff]  ;;  %123 = vmatprep.mubr.f32.mxu0 %v528_v12  ;;  %v529_v15 = vmov 1   ;;  %v530_v16 = vmov 3   ;;  %v531_v17 = vmov 2   ;;  %s535_s29 = smov 96  }
   0x4   :  { %v445_v13 = vpack.c.bf16 %v40_v11, %v38_v9  ;;  %v234_v14 = vld [vmem:[%s682_s1] sm:$0x3]  ;;  %487 = vset.pattern.permute.xlu1 %v529_v15  ;;  %491 = vset.pattern.permute.xlu0 %v530_v16  ;;  %v136_v18 = vld [vmem:[%s683_s2 + $0x30] sm:$0xff]  ;;  %v532_v20 = vmov 0.0|0.0   ;;  %v533_v22 = vmov 0   ;;  %vm55_vm3 = vcmask 130048  }
   0x5   :  { %444 = vmatprep.subr.bf16.mxu0 %v443_v10  ;;  %242 = vperm.xlu1 %487, %v234_v14   ;;  %v137_v19 = vld [vmem:[%s683_s2 + $0x40] sm:$0xff]  ;;  %v138_v33 = vld [vmem:[%s683_s2 + $0x50] sm:$0xff]  ;;  %vm534_vm4 = vmmov 0   ;;  %v46_v55 = vshrl.u32 %v45_v54, 7  ;;  %s536_s11 = smov 32   ;;  %vm279_vm5 = vcmask 261120  }
   0x6   :  { %446 = vmatpush1.bf16.msra.mxu0 %v445_v13  ;;  %447 = vmatprep.subr.bf16.mxu1 %v532_v20  ;;  %v448_v21 = vpack.c.bf16 %v137_v19, %v136_v18  ;;  %v139_v34 = vld [vmem:[%s683_s2 + $0x60] sm:$0xff]  ;;  %v140_v36 = vld [vmem:[%s683_s2 + $0x70] sm:$0xff]  ;;  %s537_s14 = smov [#allocation2]   ;;  %vm354_vm6 = vcmask 58368  }
   0x7   :  { %471 = vmatprep.subr.bf16.mxu0 %v532_v20  ;;  %v451_v35 = vpack.c.bf16 %v139_v34, %v138_v33  ;;  %v141_v37 = vld [vmem:[%s683_s2 + $0x80] sm:$0xff]  ;;  %v142_v39 = vld [vmem:[%s683_s2 + $0x90] sm:$0xff]  ;;  %429 = vmatprep.mubr.msk.f32.mxu1 %vm534_vm4, %v528_v12  ;;  %v47_v56 = vsub.s32 0, %v46_v55  ;;  %v51_v11 = vsub.s32 1, %v46_v55  ;;  %s362_s15 = sshll.u32 %s537_s14, 4  ;;  %s363_s15 = int_to_ptr.vmem [resolvable:$true] %s362_s15 }
   0x8   :  { %449 = vmatpush3.bf16.msra.mxu1 %v448_v21  ;;  %v454_v38 = vpack.c.bf16 %v141_v37, %v140_v36  ;;  %v143_v40 = vld [vmem:[%s683_s2 + $0xa0] sm:$0xff]  ;;  %v144_v42 = vld [vmem:[%s683_s2 + $0xb0] sm:$0xff]  ;;  %s504_s16 = scalar_lea.vmem %s363_s15, 32  ;;  %p509_p1 = scmp.lt.s32.totalorder %s363_s15, %s363_s15 }
   0x9   :  { %488 = vset.pattern.permute.xlu1 %v531_v17  ;;  %450 = vmatprep.subr.bf16.mxu1 %v532_v20  ;;  %v457_v41 = vpack.c.bf16 %v143_v40, %v142_v39  ;;  %v145_v43 = vld [vmem:[%s683_s2 + $0xc0] sm:$0xff]  ;;  %v146_v45 = vld [vmem:[%s683_s2 + $0xd0] sm:$0xff]  ;;  %p505_p0 = scmp.ne.s32.totalorder %s363_s15, %s504_s16  ;;  %p510_p2 = scmp.lt.s32.totalorder %s504_s16, %s504_s16 }
   0xa   :  { %252 = vperm.xlu1 %488, %v234_v14   ;;  %v460_v44 = vpack.c.bf16 %v145_v43, %v144_v42  ;;  %v147_v46 = vld [vmem:[%s683_s2 + $0xe0] sm:$0xff]  ;;  %v148_v48 = vld [vmem:[%s683_s2 + $0xf0] sm:$0xff] }
   0xb   :  { %v463_v47 = vpack.c.bf16 %v147_v46, %v146_v45  ;;  %v149_v49 = vld [vmem:[%s683_s2 + $0x100] sm:$0xff]  ;;  %v150_v51 = vld [vmem:[%s683_s2 + $0x110] sm:$0xff]  ;;  %p511_p3 = por %p510_p2, %p509_p1 }
   0xc   :  { %452 = vmatpush3.bf16.msra.mxu1 %v451_v35  ;;  %v466_v50 = vpack.c.bf16 %v149_v49, %v148_v48  ;;  %v151_v52 = vld [vmem:[%s683_s2 + $0x120] sm:$0xff]  ;;  %v268_v17 = vld [vmem:[%s683_s2 + $0x150] sm:$0xff] }
   0xd   :  { %453 = vmatprep.subr.bf16.mxu1 %v532_v20  ;;  %v469_v53 = vpack.c.bf16 %v151_v52, %v150_v51  ;;  %v370_v57 = vld [vmem:[%s683_s2 + $0x20] ss:$8 sm:$0x3]  ;;  %p512_p4 = pnand %p511_p3, %p505_p0 }
   0xe   :  { %489 = vset.pattern.permute.xlu1 %v533_v22  ;;  %v48_v58 = vrot.slane %v370_v57, %v47_v56  ;;  %v269_v18 = vld [vmem:[%s683_s2 + $0x160] sm:$0xff] }
   0xf   :  { %237 = vperm.xlu1 %489, %v234_v14   ;;  %v271_v39 = vld [vmem:[%s683_s2 + $0x180] ss:$0 sm:$0xff] }
  0x10   :  { %455 = vmatpush3.bf16.msra.mxu1 %v454_v38 }
  0x11   :  { %456 = vmatprep.subr.bf16.mxu1 %v532_v20 }
  0x13   :  { %490 = vset.pattern.permute.xlu1 %v530_v16  ;;  %v267_v16 = vld [vmem:[%s683_s2 + $0x140] sm:$0xff] }
  0x14   :  { %262 = vperm.xlu1 %490, %v234_v14   ;;  %458 = vmatpush3.bf16.msra.mxu1 %v457_v41  ;;  %v472_v22 = vpack.c.bf16 %v268_v17, %v267_v16 }
  0x15   :  { %459 = vmatprep.subr.bf16.mxu1 %v532_v20 }
  0x18   :  { %461 = vmatpush3.bf16.msra.mxu1 %v460_v44 }
  0x19   :  { %462 = vmatprep.subr.bf16.mxu1 %v532_v20 }
  0x1c   :  { %464 = vmatpush3.bf16.msra.mxu1 %v463_v47 }
  0x1d   :  { %465 = vmatprep.subr.bf16.mxu1 %v532_v20 }
  0x20   :  { %467 = vmatpush3.bf16.msra.mxu1 %v466_v50 }
  0x21   :  { %468 = vmatprep.subr.bf16.mxu1 %v532_v20 }
  0x24   :  { %470 = vmatpush3.bf16.msra.mxu1 %v469_v53 }
  0x84   :  { %v243_v13 = vpop.permute.xlu1 %242 }
  0x90   :  { %v19_v2 = vpop.xlane.xlu0 %18 }
  0x91   :  { %v561_v3 = vmul.f32 0.0625, %v19_v2  ;;  %v152_v2 = vld [vmem:[%s683_s2 + $0x130] ss:$0 sm:$0xff] }
  0x93   :  { %v22_v4 = vsub.f32 %v15_v0, %v561_v3 }
  0x95   :  { %v23_v5 = vmul.f32 %v22_v4, %v22_v4 }
  0x97   :  { %v24_v6 = vsel %vm16_vm0, %v23_v5, 0.0 }
  0x98   :  { %25 = vadd.xlane.f32.xlu0 %v24_v6 }
 0x125   :  { %v26_v23 = vpop.xlane.xlu0 %25 }
 0x126   :  { %v27_v24 = vmul.f32 0.0625, %v26_v23  ;;  %v270_v23 = vld [vmem:[%s683_s2 + $0x170] sm:$0xff] }
 0x128   :  { %v28_v25 = vadd.f32 1e-05, %v27_v24  ;;  %v475_v24 = vpack.c.bf16 %v270_v23, %v269_v18 }
 0x12a   :  { %492 = vrsqrt.f32 %v28_v25  ;;  %vm31_vm1 = vcmp.eq.f32.partialorder %v28_v25, inf  ;;  %v34_v28 = vand.u32 2147483648, %v28_v25  ;;  %vm33_vm2 = vcmp.eq.f32.partialorder %v28_v25, 0.0 }
 0x134   :  { %v493_v26 = vpop.eup %492 }
 0x135   :  { %v30_v27 = vmul.f32 %v493_v26, %v28_v25 }
 0x137   :  { %v32_v29 = vsel %vm31_vm1, %v28_v25, %v30_v27  ;;  %v253_v25 = vpop.permute.xlu1 %252 }
 0x138   :  { %v589_v30 = vsel %vm33_vm2, %v34_v28, %v32_v29 }
 0x139   :  { %494 = vrcp.f32 %v589_v30 }
 0x13b   :  { %v238_v27 = vpop.permute.xlu1 %237 }
 0x13f   :  { %v263_v28 = vpop.permute.xlu1 %262 }
 0x143   :  { %v495_v31 = vpop.eup %494 }
 0x144   :  { %v37_v32 = vmul.f32 %v495_v31, %v22_v4 }
 0x146   :  { %371 = vmatmul.mubr.msk.f32.vlgmr.msra.gmra.mrb[0].mxu0 %vm55_vm3, %v37_v32 }
 0x147   :  { %440 = vmatprep.mubr.msk.f32.mxu0 %vm534_vm4, %v528_v12  ;;  %v52_v12 = vrot.slane %v370_v57, %v51_v11  ;;  %473 = vmatpush3.bf16.msra.mxu0 %v472_v22 }
 0x148   :  { %474 = vmatprep.subr.bf16.mxu0 %v532_v20 }
 0x14b   :  { %476 = vmatpush3.bf16.msra.mxu0 %v475_v24 }
 0x219   :  { %v125_v59 = vpop.f32.mrb[0].mxu0 }
 0x21a   :  { %v126_v60 = vadd.f32 %v125_v59, %v48_v58  ;;  %v127_v61 = vpop.f32.mrb[1].mxu0 }
 0x21b   :  { %v128_v19 = vadd.f32 %v127_v61, %v52_v12 }
 0x21c   :  { %v372_v62 = vmul.f32 -1.442695, %v126_v60 }
 0x21d   :  { %v255_v26 = vmul.f32 %v253_v25, %v128_v19  ;;  %v265_v34 = vmul.f32 %v263_v28, %v128_v19 }
 0x21e   :  { %496 = vpow2.f32 %v372_v62 }
 0x228   :  { %v497_v63 = vpop.eup %496 }
 0x229   :  { %v133_v0 = vadd.f32 1.0, %v497_v63 }
 0x22b   :  { %498 = vrcp.f32 %v133_v0 }
 0x235   :  { %v499_v1 = vpop.eup %498 }
 0x236   :  { %430 = vmatmul.mubr.f32.vlgmr.msra.gmra.mrb[0].mxu1 %v499_v1 }
 0x309   :  { %v219_v4 = vpop.f32.mrb[0].mxu1 }
 0x30a   :  { %v220_v5 = vadd.f32 %v219_v4, %v152_v2  ;;  %v431_v6 = vpop.f32.mrb[1].mxu1 }
 0x30c   :  { %v373_v7 = vmul.f32 -1.442695, %v220_v5 }
 0x30e   :  { %500 = vpow2.f32 %v373_v7 }
 0x318   :  { %v501_v8 = vpop.eup %500 }
 0x319   :  { %v226_v9 = vadd.f32 1.0, %v501_v8 }
 0x31b   :  { %502 = vrcp.f32 %v226_v9 }
 0x325   :  { %v503_v10 = vpop.eup %502 }
 0x326   :  { %230 = vrot.lane.b32.xlu0 %v503_v10, %s535_s29  ;;  %v240_v31 = vmul.f32 %v503_v10, %v238_v27 }
 0x398   :  { %v231_v14 = vpop.permute.xlu0 %230 }
 0x399   :  { %v233_v15 = vadd.f32 %v503_v10, %v231_v14 }
 0x39b   :  { %v245_v21 = vmul.f32 %v243_v13, %v233_v15 }
 0x39d   :  { %247 = vrot.lane.b32.xlu1 %v245_v21, %s535_s29 }
 0x3a1   :  { %257 = vrot.lane.b32.xlu1 %v255_v26, %s536_s11 }
 0x3a5   :  { %272 = vrot.lane.b32.xlu1 %v503_v10, %s536_s11 }
 0x40f   :  { %v248_v29 = vpop.permute.xlu1 %247 }
 0x410   :  { %v250_v32 = vadd.f32 %v248_v29, %v240_v31 }
 0x413   :  { %v258_v33 = vpop.permute.xlu1 %257 }
 0x414   :  { %v260_v35 = vadd.f32 %v258_v33, %v250_v32 }
 0x416   :  { %v266_v36 = vadd.f32 %v265_v34, %v260_v35 }
 0x417   :  { %v273_v37 = vpop.permute.xlu1 %272 }
 0x418   :  { %v275_v38 = vadd.f32 %v273_v37, %v266_v36 }
 0x41a   :  { %277 = vrot.lane.b32.xlu1 %v275_v38, %s535_s29 }
 0x48c   :  { %v278_v20 = vpop.permute.xlu1 %277 }
 0x48d   :  { %441 = vmatmul.mubr.msk.f32.vlgmr.msra.gmra.mrb[2].mxu0 %vm279_vm5, %v278_v20 }
 0x560   :  { %v348_v40 = vpop.f32.mrb[2].mxu0 }
 0x561   :  { %v349_v41 = vadd.f32 %v348_v40, %v271_v39  ;;  %v442_v42 = vpop.f32.mrb[3].mxu0 }
 0x563   :  { %v352_v43 = vmul.f32 %v349_v41, %v589_v30 }
 0x565   :  { %v353_v44 = vadd.f32 %v352_v43, %v561_v3 }
 0x567   :  { %355 = vst.msk [vmem:[#allocation2] sm:$0x3] %vm354_vm6, %v353_v44 }
 0x568   :  { %515 = shalt.err (!%p512_p4)
}
 0x569   :  { %s516_s0 = scalar_lea.hbm %s684_s3, 32 }
 0x56a   :  { %p517_p5 = scmp.ne.s32.totalorder %s684_s3, %s516_s0  ;;  %p520_p6 = scmp.lt.u32.totalorder %s516_s0, %s684_s3 }
 0x56c   :  { %p522_p7 = pnand %p520_p6, %p517_p5 }
 0x56e   :  { %525 = shalt.err (!%p522_p7)
}
 0x56f   :  { %365 = dma.vmem_to_hbm [thread:$0]  %s363_s15, 32, %s684_s3, [#allocation3]  }
 0x570   :  { %526 = dma.done.wait [#allocation3], 32  }
 0x571   :  { %527 = vsyncadd [#allocation3], 4294967264 }
 0x572   :  { %369 = vsyncpa [#allocation3], 1 }

</bundles_post_ra>
